<compile_context>
chip_gen: v7x
topology: tpu7x:2x2x1
jax: 0.10.0
libtpu: 0.0.40
codegen_flags: <defaults>
</compile_context>

<pallas_src>
import math

import jax
import jax.numpy as jnp
from jax.experimental import pallas as pl
from jax.experimental.pallas import tpu as pltpu


def _strict_cross_attention_kernel(
    clean_ref, aug_ref,
    wq_ref, bq_ref, wkv_ref, bkv_ref,
    wp1_ref, bp1_ref, wp2_ref, bp2_ref,
    out_ref,
):
    BB, S, Din = clean_ref.shape
    H = wq_ref.shape[1]

    # ---- projections: flatten batch into sublanes, one matmul per input stream ----
    clean2d = clean_ref[...].reshape(BB * S, Din)
    aug2d = aug_ref[...].reshape(BB * S, Din)

    q2d = jnp.dot(clean2d, wq_ref[...],
                  preferred_element_type=jnp.float32) + bq_ref[...]        # (BB*S, H)
    kv2d = jnp.dot(aug2d, wkv_ref[...],
                   preferred_element_type=jnp.float32) + bkv_ref[...]      # (BB*S, 2H)

    q = q2d.reshape(BB, S, H).astype(jnp.bfloat16)
    kv = kv2d.reshape(BB, S, 2 * H)
    k = kv[:, :, :H].astype(jnp.bfloat16)
    v = kv[:, :, H:].astype(jnp.bfloat16)

    # ---- scaled attention scores (bf16 operands, f32 accumulation) ----
    scores = jnp.einsum('bqh,bkh->bqk', q, k,
                        preferred_element_type=jnp.float32) * (1.0 / math.sqrt(H))

    # ---- online-style softmax, normalization deferred to an EUP reciprocal ----
    m = jnp.max(scores, axis=-1, keepdims=True)
    p = jnp.exp(scores - m)                                   # (BB, S, S) unnormalized
    l = jnp.sum(p, axis=-1, keepdims=True)                    # (BB, S, 1)
    inv_l = pl.reciprocal(l, approx=True)

    # ---- fold the mean over the query axis into the attention @ V matmul:
    #      pooled[b] = (1/S) * sum_q (p[b,q,:]/l[b,q]) @ v[b]
    w = jnp.sum(p * inv_l, axis=1, keepdims=True) * (1.0 / S)  # (BB, 1, S_k)
    pooled = jnp.einsum('bqk,bkh->bqh', w.astype(jnp.bfloat16), v,
                        preferred_element_type=jnp.float32)[:, 0, :]       # (BB, H)

    # ---- projection head: Linear -> ReLU -> Dropout(identity, eval) -> Linear ----
    # TODO(synk): nn.Dropout is omitted (inference/eval mode).
    hidden = jnp.maximum(
        jnp.dot(pooled, wp1_ref[...],
                preferred_element_type=jnp.float32) + bp1_ref[...], 0.0)
    logit = jnp.dot(hidden, wp2_ref[...],
                    preferred_element_type=jnp.float32) + bp2_ref[...]     # (BB, 1)

    # 1 - sigmoid(-x) == sigmoid(x); lane-dense store (whole 128-lane slab).
    out_ref[...] = jnp.broadcast_to(jax.nn.sigmoid(logit), out_ref.shape)


def _predict_pallas(clean, aug, params):
    B, S, Din = clean.shape

    # Fuse K and V projection weights along the output dim (one wider matmul).
    wkv = jnp.concatenate([params["wk"], params["wv"]], axis=1)   # (Din, 2H)
    bkv = jnp.concatenate([params["bk"], params["bv"]], axis=1)   # (1, 2H)

    # Batch tile: whole batch when tiny, otherwise sublane-aligned blocks of 8.
    BB = B if B < 8 else 8
    grid = (pl.cdiv(B, BB),)

    args = (
        clean, aug,
        params["wq"], params["bq"], wkv, bkv,
        params["wp1"], params["bp1"], params["wp2"], params["bp2"],
    )

    def _resident_spec(a):
        shp = a.shape
        return pl.BlockSpec(shp, lambda b, _n=len(shp): (0,) * _n)

    in_specs = [
        pl.BlockSpec((BB, S, Din), lambda b: (b, 0, 0)),   # clean tile per grid step
        pl.BlockSpec((BB, S, Din), lambda b: (b, 0, 0)),   # aug tile per grid step
    ] + [_resident_spec(a) for a in args[2:]]              # weights/biases resident

    out = pl.pallas_call(
        _strict_cross_attention_kernel,
        out_shape=jax.ShapeDtypeStruct((B, 128), jnp.float32),  # lane-dense slab
        grid=grid,
        in_specs=in_specs,
        out_specs=pl.BlockSpec((BB, 128), lambda b: (b, 0)),
        compiler_params=pltpu.CompilerParams(
            dimension_semantics=("parallel",)),                 # megacore split on v7x
    )(*args)
    return out[:, 0]                                            # (B,) like torch .squeeze(1)


def strict_cross_attention_forward(x, y, l_value, params):
    """Plain-JAX glue replicating StrictCrossAttention.forward semantics."""
    # _fix_shapes: zero-pad the shorter sequence (dim -2) to match (no key/query mask,
    # matching the torch module which also attends over the zero-padded positions).
    diff = y.shape[-2] - x.shape[-2]
    if diff > 0:
        x = jnp.pad(x, ((0, 0), (0, diff), (0, 0)))
    elif diff < 0:
        y = jnp.pad(y, ((0, 0), (0, -diff), (0, 0)))

    # Data-dependent batch selection + feature concat -> dynamic shapes, so it stays
    # outside the kernel (and outside jit), exactly as the torch module does it.
    # As in torch, the batched matmul requires count(mask) == count(~mask).
    mask = l_value > 0.5
    clean = jnp.concatenate([x[mask], y[mask]], axis=-1)        # (B_true,  S, 2*Dh)
    aug = jnp.concatenate([y[~mask], x[~mask]], axis=-1)        # (B_false, S, 2*Dh)

    return _predict_pallas(clean, aug, params)


def _xavier_uniform(key, fan_in, fan_out):
    bound = math.sqrt(6.0 / (fan_in + fan_out))
    return jax.random.uniform(key, (fan_in, fan_out), jnp.float32, -bound, bound)


def init_params(key, input_dim, hidden_dim):
    ks = jax.random.split(key, 5)
    return {
        "wq": _xavier_uniform(ks[0], input_dim, hidden_dim),
        "bq": jnp.zeros((1, hidden_dim), jnp.float32),
        "wk": _xavier_uniform(ks[1], input_dim, hidden_dim),
        "bk": jnp.zeros((1, hidden_dim), jnp.float32),
        "wv": _xavier_uniform(ks[2], input_dim, hidden_dim),
        "bv": jnp.zeros((1, hidden_dim), jnp.float32),
        "wp1": _xavier_uniform(ks[3], hidden_dim, hidden_dim),
        "bp1": jnp.zeros((1, hidden_dim), jnp.float32),
        "wp2": _xavier_uniform(ks[4], hidden_dim, 1),
        "bp2": jnp.zeros((1, 1), jnp.float32),
    }


if __name__ == "__main__":
    # Small shapes consistent with the module:
    #   per-stream feature Dh=16 -> concatenated input_dim=32, hidden_dim=32,
    #   total batch=4 (2 "clean" + 2 "aug"), seq lens 6 vs 8 (exercises _fix_shapes pad).
    Dh, input_dim, hidden_dim = 16, 32, 32
    B, Sx, Sy = 4, 6, 8

    root = jax.random.PRNGKey(0)
    k_params, k_x, k_y = jax.random.split(root, 3)

    params = init_params(k_params, input_dim, hidden_dim)
    x = jax.random.normal(k_x, (B, Sx, Dh), jnp.float32)
    y = jax.random.normal(k_y, (B, Sy, Dh), jnp.float32)
    l_value = jnp.array([1.0, 0.0, 1.0, 0.0], jnp.float32)      # 2 clean / 2 aug

    out = strict_cross_attention_forward(x, y, l_value, params)
    jax.block_until_ready(out)
    assert out.shape == (2,)
    assert bool(jnp.all(jnp.isfinite(out)))
    print("KERNEL_OK")
</pallas_src>

<mosaic_0001>
module attributes {stable_mosaic.version = 11 : i64} {
  func.func @_strict_cross_attention_kernel(%arg0: i32, %arg1: memref<2x8x32xf32, #tpu.memory_space<vmem>>, %arg2: memref<2x8x32xf32, #tpu.memory_space<vmem>>, %arg3: memref<32x32xf32, #tpu.memory_space<vmem>>, %arg4: memref<1x32xf32, #tpu.memory_space<vmem>>, %arg5: memref<32x64xf32, #tpu.memory_space<vmem>>, %arg6: memref<1x64xf32, #tpu.memory_space<vmem>>, %arg7: memref<32x32xf32, #tpu.memory_space<vmem>>, %arg8: memref<1x32xf32, #tpu.memory_space<vmem>>, %arg9: memref<32x1xf32, #tpu.memory_space<vmem>>, %arg10: memref<1x1xf32, #tpu.memory_space<vmem>>, %arg11: memref<2x128xf32, #tpu.memory_space<vmem>>) attributes {dimension_semantics = [#tpu.dimension_semantics<parallel>], iteration_bounds = array<i64: 1>, scalar_prefetch = 0 : i64, scratch_operands = 0 : i64, tpu.core_type = #tpu.core_type<tc>, window_params = [{transform_indices = @transform_0, window_bounds = array<i64: 2, 8, 32>}, {transform_indices = @transform_1, window_bounds = array<i64: 2, 8, 32>}, {pipeline_mode = #tpu.pipeline_mode<synchronous>, transform_indices = @transform_2, window_bounds = array<i64: 32, 32>}, {pipeline_mode = #tpu.pipeline_mode<synchronous>, transform_indices = @transform_3, window_bounds = array<i64: 1, 32>}, {pipeline_mode = #tpu.pipeline_mode<synchronous>, transform_indices = @transform_4, window_bounds = array<i64: 32, 64>}, {pipeline_mode = #tpu.pipeline_mode<synchronous>, transform_indices = @transform_5, window_bounds = array<i64: 1, 64>}, {pipeline_mode = #tpu.pipeline_mode<synchronous>, transform_indices = @transform_6, window_bounds = array<i64: 32, 32>}, {pipeline_mode = #tpu.pipeline_mode<synchronous>, transform_indices = @transform_7, window_bounds = array<i64: 1, 32>}, {pipeline_mode = #tpu.pipeline_mode<synchronous>, transform_indices = @transform_8, window_bounds = array<i64: 32, 1>}, {pipeline_mode = #tpu.pipeline_mode<synchronous>, transform_indices = @transform_9, window_bounds = array<i64: 1, 1>}, {transform_indices = @transform_10, window_bounds = array<i64: 2, 128>}]} {
    %c0 = arith.constant 0 : index
    %c0_0 = arith.constant 0 : index
    %c0_1 = arith.constant 0 : index
    %0 = vector.load %arg1[%c0, %c0_0, %c0_1] : memref<2x8x32xf32, #tpu.memory_space<vmem>>, vector<2x8x32xf32>
    %1 = vector.shape_cast %0 : vector<2x8x32xf32> to vector<16x32xf32>
    %c0_2 = arith.constant 0 : index
    %c0_3 = arith.constant 0 : index
    %c0_4 = arith.constant 0 : index
    %2 = vector.load %arg2[%c0_2, %c0_3, %c0_4] : memref<2x8x32xf32, #tpu.memory_space<vmem>>, vector<2x8x32xf32>
    %3 = vector.shape_cast %2 : vector<2x8x32xf32> to vector<16x32xf32>
    %c0_5 = arith.constant 0 : index
    %c0_6 = arith.constant 0 : index
    %4 = vector.load %arg3[%c0_5, %c0_6] : memref<32x32xf32, #tpu.memory_space<vmem>>, vector<32x32xf32>
    %cst = arith.constant dense<0.000000e+00> : vector<16x32xf32>
    %5 = tpu.matmul %1, %4, %cst {dimension_numbers = #tpu.dot_dimension_numbers<[1], [0], [0], [1], [0, 0, 1, 1], [], []>} : vector<16x32xf32>, vector<32x32xf32>, vector<16x32xf32> -> vector<16x32xf32>
    %c0_7 = arith.constant 0 : index
    %c0_8 = arith.constant 0 : index
    %6 = vector.load %arg4[%c0_7, %c0_8] : memref<1x32xf32, #tpu.memory_space<vmem>>, vector<1x32xf32>
    %7 = vector.broadcast %6 : vector<1x32xf32> to vector<16x32xf32>
    %8 = arith.addf %5, %7 : vector<16x32xf32>
    %c0_9 = arith.constant 0 : index
    %c0_10 = arith.constant 0 : index
    %9 = vector.load %arg5[%c0_9, %c0_10] : memref<32x64xf32, #tpu.memory_space<vmem>>, vector<32x64xf32>
    %cst_11 = arith.constant dense<0.000000e+00> : vector<16x64xf32>
    %10 = tpu.matmul %3, %9, %cst_11 {dimension_numbers = #tpu.dot_dimension_numbers<[1], [0], [0], [1], [0, 0, 1, 1], [], []>} : vector<16x32xf32>, vector<32x64xf32>, vector<16x64xf32> -> vector<16x64xf32>
    %c0_12 = arith.constant 0 : index
    %c0_13 = arith.constant 0 : index
    %11 = vector.load %arg6[%c0_12, %c0_13] : memref<1x64xf32, #tpu.memory_space<vmem>>, vector<1x64xf32>
    %12 = vector.broadcast %11 : vector<1x64xf32> to vector<16x64xf32>
    %13 = arith.addf %10, %12 : vector<16x64xf32>
    %14 = vector.shape_cast %8 : vector<16x32xf32> to vector<2x8x32xf32>
    %15 = arith.truncf %14 : vector<2x8x32xf32> to vector<2x8x32xbf16>
    %16 = vector.shape_cast %13 : vector<16x64xf32> to vector<2x8x64xf32>
    %17 = vector.extract_strided_slice %16 {offsets = [0, 0, 0], sizes = [2, 8, 32], strides = [1, 1, 1]} : vector<2x8x64xf32> to vector<2x8x32xf32>
    %18 = arith.truncf %17 : vector<2x8x32xf32> to vector<2x8x32xbf16>
    %19 = vector.extract_strided_slice %16 {offsets = [0, 0, 32], sizes = [2, 8, 32], strides = [1, 1, 1]} : vector<2x8x64xf32> to vector<2x8x32xf32>
    %20 = arith.truncf %19 : vector<2x8x32xf32> to vector<2x8x32xbf16>
    "tpu.trace_start"() <{level = 10 : i32, message = "bqh,bkh->bqk"}> : () -> ()
    %cst_14 = arith.constant dense<0.000000e+00> : vector<2x8x8xf32>
    %21 = tpu.matmul %15, %18, %cst_14 {dimension_numbers = #tpu.dot_dimension_numbers<[2], [2], [1], [1], [0, 0, 0, 1, 1, 1], [0], [0]>} : vector<2x8x32xbf16>, vector<2x8x32xbf16>, vector<2x8x8xf32> -> vector<2x8x8xf32>
    "tpu.trace_stop"() : () -> ()
    %cst_15 = arith.constant 0.176776692 : f32
    %22 = vector.broadcast %cst_15 : f32 to vector<2x8x8xf32>
    %23 = arith.mulf %21, %22 : vector<2x8x8xf32>
    %cst_16 = arith.constant dense<0xFF800000> : vector<2x8xf32>
    %24 = vector.multi_reduction <maximumf>, %23, %cst_16 [2] : vector<2x8x8xf32> to vector<2x8xf32>
    %25 = vector.shape_cast %24 : vector<2x8xf32> to vector<2x8x1xf32>
    %26 = vector.broadcast %25 : vector<2x8x1xf32> to vector<2x8x8xf32>
    %27 = arith.subf %23, %26 : vector<2x8x8xf32>
    %28 = math.exp %27 : vector<2x8x8xf32>
    %cst_17 = arith.constant dense<0.000000e+00> : vector<2x8xf32>
    %29 = vector.multi_reduction <add>, %28, %cst_17 [2] : vector<2x8x8xf32> to vector<2x8xf32>
    %30 = vector.shape_cast %29 : vector<2x8xf32> to vector<2x8x1xf32>
    %31 = tpu.reciprocal %30 {approx = true} : vector<2x8x1xf32> -> vector<2x8x1xf32>
    %32 = vector.broadcast %31 : vector<2x8x1xf32> to vector<2x8x8xf32>
    %33 = arith.mulf %28, %32 : vector<2x8x8xf32>
    %cst_18 = arith.constant dense<0.000000e+00> : vector<2x8xf32>
    %34 = vector.multi_reduction <add>, %33, %cst_18 [1] : vector<2x8x8xf32> to vector<2x8xf32>
    %35 = vector.shape_cast %34 : vector<2x8xf32> to vector<2x1x8xf32>
    %cst_19 = arith.constant 1.250000e-01 : f32
    %36 = vector.broadcast %cst_19 : f32 to vector<2x1x8xf32>
    %37 = arith.mulf %35, %36 : vector<2x1x8xf32>
    %38 = arith.truncf %37 : vector<2x1x8xf32> to vector<2x1x8xbf16>
    "tpu.trace_start"() <{level = 10 : i32, message = "bqk,bkh->bqh"}> : () -> ()
    %cst_20 = arith.constant dense<0.000000e+00> : vector<2x1x32xf32>
    %39 = tpu.matmul %38, %20, %cst_20 {dimension_numbers = #tpu.dot_dimension_numbers<[2], [1], [1], [2], [0, 0, 0, 1, 1, 2], [0], [0]>} : vector<2x1x8xbf16>, vector<2x8x32xbf16>, vector<2x1x32xf32> -> vector<2x1x32xf32>
    "tpu.trace_stop"() : () -> ()
    %40 = vector.shape_cast %39 : vector<2x1x32xf32> to vector<2x32xf32>
    %c0_21 = arith.constant 0 : index
    %c0_22 = arith.constant 0 : index
    %41 = vector.load %arg7[%c0_21, %c0_22] : memref<32x32xf32, #tpu.memory_space<vmem>>, vector<32x32xf32>
    %cst_23 = arith.constant dense<0.000000e+00> : vector<2x32xf32>
    %42 = tpu.matmul %40, %41, %cst_23 {dimension_numbers = #tpu.dot_dimension_numbers<[1], [0], [0], [1], [0, 0, 1, 1], [], []>} : vector<2x32xf32>, vector<32x32xf32>, vector<2x32xf32> -> vector<2x32xf32>
    %c0_24 = arith.constant 0 : index
    %c0_25 = arith.constant 0 : index
    %43 = vector.load %arg8[%c0_24, %c0_25] : memref<1x32xf32, #tpu.memory_space<vmem>>, vector<1x32xf32>
    %44 = vector.broadcast %43 : vector<1x32xf32> to vector<2x32xf32>
    %45 = arith.addf %42, %44 : vector<2x32xf32>
    %cst_26 = arith.constant 0.000000e+00 : f32
    %46 = vector.broadcast %cst_26 : f32 to vector<2x32xf32>
    %47 = arith.maximumf %45, %46 : vector<2x32xf32>
    %c0_27 = arith.constant 0 : index
    %c0_28 = arith.constant 0 : index
    %48 = vector.load %arg9[%c0_27, %c0_28] : memref<32x1xf32, #tpu.memory_space<vmem>>, vector<32x1xf32>
    %cst_29 = arith.constant dense<0.000000e+00> : vector<2x1xf32>
    %49 = tpu.matmul %47, %48, %cst_29 {dimension_numbers = #tpu.dot_dimension_numbers<[1], [0], [0], [1], [0, 0, 1, 1], [], []>} : vector<2x32xf32>, vector<32x1xf32>, vector<2x1xf32> -> vector<2x1xf32>
    %c0_30 = arith.constant 0 : index
    %c0_31 = arith.constant 0 : index
    %50 = vector.load %arg10[%c0_30, %c0_31] : memref<1x1xf32, #tpu.memory_space<vmem>>, vector<1x1xf32>
    %51 = vector.broadcast %50 : vector<1x1xf32> to vector<2x1xf32>
    %52 = arith.addf %49, %51 : vector<2x1xf32>
    %53 = arith.negf %52 : vector<2x1xf32>
    %54 = math.exp %53 : vector<2x1xf32>
    %cst_32 = arith.constant 1.000000e+00 : f32
    %55 = vector.broadcast %cst_32 : f32 to vector<2x1xf32>
    %56 = arith.addf %55, %54 : vector<2x1xf32>
    %57 = arith.divf %55, %56 : vector<2x1xf32>
    %58 = vector.shape_cast %57 : vector<2x1xf32> to vector<2x1xf32>
    %59 = vector.broadcast %58 : vector<2x1xf32> to vector<2x128xf32>
    %c0_33 = arith.constant 0 : index
    %c0_34 = arith.constant 0 : index
    %60 = vector.load %arg11[%c0_33, %c0_34] : memref<2x128xf32, #tpu.memory_space<vmem>>, vector<2x128xf32>
    tpu.vector_store %arg11[%c0_33, %c0_34], %59 {strides = array<i32>} : memref<2x128xf32, #tpu.memory_space<vmem>>, vector<2x128xf32>,
    return
  }
  func.func @transform_0(%arg0: i32) -> (i32, i32, i32) {
    %c0_i32 = arith.constant 0 : i32
    %c0_i32_0 = arith.constant 0 : i32
    %c0_i32_1 = arith.constant 0 : i32
    return %arg0, %c0_i32, %c0_i32_0 : i32, i32, i32
  }
  func.func @transform_1(%arg0: i32) -> (i32, i32, i32) {
    %c0_i32 = arith.constant 0 : i32
    %c0_i32_0 = arith.constant 0 : i32
    %c0_i32_1 = arith.constant 0 : i32
    return %arg0, %c0_i32, %c0_i32_0 : i32, i32, i32
  }
  func.func @transform_2(%arg0: i32) -> (i32, i32) {
    %c0_i32 = arith.constant 0 : i32
    %c0_i32_0 = arith.constant 0 : i32
    %c0_i32_1 = arith.constant 0 : i32
    return %c0_i32, %c0_i32_0 : i32, i32
  }
  func.func @transform_3(%arg0: i32) -> (i32, i32) {
    %c0_i32 = arith.constant 0 : i32
    %c0_i32_0 = arith.constant 0 : i32
    %c0_i32_1 = arith.constant 0 : i32
    return %c0_i32, %c0_i32_0 : i32, i32
  }
  func.func @transform_4(%arg0: i32) -> (i32, i32) {
    %c0_i32 = arith.constant 0 : i32
    %c0_i32_0 = arith.constant 0 : i32
    %c0_i32_1 = arith.constant 0 : i32
    return %c0_i32, %c0_i32_0 : i32, i32
  }
  func.func @transform_5(%arg0: i32) -> (i32, i32) {
    %c0_i32 = arith.constant 0 : i32
    %c0_i32_0 = arith.constant 0 : i32
    %c0_i32_1 = arith.constant 0 : i32
    return %c0_i32, %c0_i32_0 : i32, i32
  }
  func.func @transform_6(%arg0: i32) -> (i32, i32) {
    %c0_i32 = arith.constant 0 : i32
    %c0_i32_0 = arith.constant 0 : i32
    %c0_i32_1 = arith.constant 0 : i32
    return %c0_i32, %c0_i32_0 : i32, i32
  }
  func.func @transform_7(%arg0: i32) -> (i32, i32) {
    %c0_i32 = arith.constant 0 : i32
    %c0_i32_0 = arith.constant 0 : i32
    %c0_i32_1 = arith.constant 0 : i32
    return %c0_i32, %c0_i32_0 : i32, i32
  }
  func.func @transform_8(%arg0: i32) -> (i32, i32) {
    %c0_i32 = arith.constant 0 : i32
    %c0_i32_0 = arith.constant 0 : i32
    %c0_i32_1 = arith.constant 0 : i32
    return %c0_i32, %c0_i32_0 : i32, i32
  }
  func.func @transform_9(%arg0: i32) -> (i32, i32) {
    %c0_i32 = arith.constant 0 : i32
    %c0_i32_0 = arith.constant 0 : i32
    %c0_i32_1 = arith.constant 0 : i32
    return %c0_i32, %c0_i32_0 : i32, i32
  }
  func.func @transform_10(%arg0: i32) -> (i32, i32) {
    %c0_i32 = arith.constant 0 : i32
    %c0_i32_0 = arith.constant 0 : i32
    return %arg0, %c0_i32 : i32, i32
  }
}

</mosaic_0001>

<bundles_post_ra>
// kernel: tpu_custom_call.1
= control target key start
LH: loop header
LB: loop body
LE: loop exit
PB: predicated region body
PF: predicated region fallthrough
CT: control target
= control target key end

     0   :  { %s1233_s0 = inlined_call_operand.hbm [shape: f32[2,8,32], index: 0, kind: input, shape index: {}]   ;;  %s1234_s1 = inlined_call_operand.hbm [shape: f32[2,8,32], index: 1, kind: input, shape index: {}]   ;;  %s1235_s2 = inlined_call_operand.vmem [shape: f32[32,32], index: 2, kind: input, shape index: {}]   ;;  %s1236_s3 = inlined_call_operand.vmem [shape: f32[1,32], index: 3, kind: input, shape index: {}]   ;;  %s1237_s4 = inlined_call_operand.hbm [shape: f32[32,64], index: 4, kind: input, shape index: {}]   ;;  %s1238_s5 = inlined_call_operand.vmem [shape: f32[1,64], index: 5, kind: input, shape index: {}]   ;;  %s1239_s6 = inlined_call_operand.hbm [shape: f32[32,32], index: 6, kind: input, shape index: {}]   ;;  %s1240_s7 = inlined_call_operand.vmem [shape: f32[1,32], index: 7, kind: input, shape index: {}]   ;;  %s1241_s8 = inlined_call_operand.vmem [shape: f32[32,1], index: 8, kind: input, shape index: {}]   ;;  %s1242_s9 = inlined_call_operand.<no memory space> [shape: f32[1,1], index: 9, kind: input, shape index: {}]   ;;  %s1243_s10 = inlined_call_operand.hbm [shape: f32[2,128], index: 10, kind: output, shape index: {}]  }
   0x1   :  { %v15_v0 = vstv %s1242_s9 }
   0x2   :  { %16 = vst [vmem:[#allocation2] sm:$0x1] %v15_v0 }
   0x3   :  { %17 = vsyncpa [#allocation4], 0 }
   0x4   :  { %18 = vsyncpa [#allocation7], 0 }
   0x5   :  { %19 = vsyncpa [#allocation10], 0 }
   0x6   :  { %20 = vsyncpa [#allocation5], 0  ;;  %s1008_s15 = smov [#allocation6]   ;;  %s1009_s17 = smov [#allocation3]  }
   0x7   :  { %s38_s16 = sshll.u32 %s1008_s15, 4  ;;  %s26_s18 = sshll.u32 %s1009_s17, 4  ;;  %s39_s16 = int_to_ptr.vmem [resolvable:$true] %s38_s16  ;;  %s1078_s18 = int_to_ptr.vmem [resolvable:$true] %s26_s18 }
   0x8   :  { %s890_s21 = scalar_lea.hbm %s1234_s1, 256 }
   0x9   :  { %p891_p0 = scmp.ne.s32.totalorder %s1234_s1, %s890_s21  ;;  %p894_p1 = scmp.lt.u32.totalorder %s890_s21, %s1234_s1 }
   0xb   :  { %p896_p2 = pnand %p894_p1, %p891_p0 }
   0xd   :  { %899 = shalt.err (!%p896_p2)
}
   0xe   :  { %s900_s25 = scalar_lea.vmem %s39_s16, 256  ;;  %p905_p4 = scmp.lt.s32.totalorder %s39_s16, %s39_s16 }
   0xf   :  { %p901_p3 = scmp.ne.s32.totalorder %s39_s16, %s900_s25  ;;  %p906_p5 = scmp.lt.s32.totalorder %s900_s25, %s900_s25 }
  0x11   :  { %p907_p6 = por %p906_p5, %p905_p4 }
  0x13   :  { %p908_p7 = pnand %p907_p6, %p901_p3 }
  0x15   :  { %911 = shalt.err (!%p908_p7)
}
  0x16   :  { %s1010_s26 = smov 128   ;;  %s1011_s27 = smov 8  }
  0x17   :  { %44 = dma.hbm_to_vmem [thread:$0]  %s1234_s1, 256, %s39_s16, [#allocation7], %s1010_s26, %s1010_s26, %s1011_s27  }
  0x18   :  { %s912_s12 = scalar_lea.hbm %s1233_s0, 256 }
  0x19   :  { %p913_p8 = scmp.ne.s32.totalorder %s1233_s0, %s912_s12  ;;  %p916_p9 = scmp.lt.u32.totalorder %s912_s12, %s1233_s0 }
  0x1b   :  { %p918_p10 = pnand %p916_p9, %p913_p8 }
  0x1d   :  { %921 = shalt.err (!%p918_p10)
}
  0x1e   :  { %s922_s19 = scalar_lea.vmem %s1078_s18, 256  ;;  %p927_p12 = scmp.lt.s32.totalorder %s1078_s18, %s1078_s18 }
  0x1f   :  { %p923_p11 = scmp.ne.s32.totalorder %s1078_s18, %s922_s19  ;;  %p928_p13 = scmp.lt.s32.totalorder %s922_s19, %s922_s19 }
  0x21   :  { %p929_p0 = por %p928_p13, %p927_p12 }
  0x23   :  { %p930_p1 = pnand %p929_p0, %p923_p11 }
  0x25   :  { %933 = shalt.err (!%p930_p1)
}
  0x26   :  { %32 = dma.hbm_to_vmem [thread:$0]  %s1233_s0, 256, %s1078_s18, [#allocation4], %s1010_s26, %s1010_s26, %s1011_s27  }
  0x27   :  { %s1012_s20 = smov [#allocation8]   ;;  %s1013_s22 = smov [#allocation9]  }
  0x28   :  { %s54_s21 = sshll.u32 %s1012_s20, 4  ;;  %s68_s23 = sshll.u32 %s1013_s22, 4  ;;  %s55_s21 = int_to_ptr.vmem [resolvable:$true] %s54_s21  ;;  %s1115_s23 = int_to_ptr.vmem [resolvable:$true] %s68_s23 }
  0x29   :  { %s934_s25 = scalar_lea.hbm %s1237_s4, 512 }
  0x2a   :  { %p935_p2 = scmp.ne.s32.totalorder %s1237_s4, %s934_s25  ;;  %p938_p3 = scmp.lt.u32.totalorder %s934_s25, %s1237_s4 }
  0x2c   :  { %p940_p4 = pnand %p938_p3, %p935_p2 }
  0x2e   :  { %943 = shalt.err (!%p940_p4)
}
  0x2f   :  { %s944_s0 = scalar_lea.vmem %s55_s21, 512  ;;  %p949_p6 = scmp.lt.s32.totalorder %s55_s21, %s55_s21 }
  0x30   :  { %p945_p5 = scmp.ne.s32.totalorder %s55_s21, %s944_s0  ;;  %p950_p7 = scmp.lt.s32.totalorder %s944_s0, %s944_s0 }
  0x32   :  { %p951_p8 = por %p950_p7, %p949_p6 }
  0x34   :  { %p952_p9 = pnand %p951_p8, %p945_p5 }
  0x36   :  { %955 = shalt.err (!%p952_p9)
}
  0x37   :  { %60 = dma.hbm_to_vmem [thread:$0]  %s1237_s4, 512, %s55_s21, [#allocation7], %s1010_s26, %s1010_s26, %s1011_s27  }
  0x38   :  { %s956_s15 = scalar_lea.hbm %s1239_s6, 512 }
  0x39   :  { %p957_p10 = scmp.ne.s32.totalorder %s1239_s6, %s956_s15  ;;  %p960_p11 = scmp.lt.u32.totalorder %s956_s15, %s1239_s6 }
  0x3b   :  { %p962_p12 = pnand %p960_p11, %p957_p10 }
  0x3d   :  { %965 = shalt.err (!%p962_p12)
}
  0x3e   :  { %s966_s20 = scalar_lea.vmem %s1115_s23, 512  ;;  %p971_p0 = scmp.lt.s32.totalorder %s1115_s23, %s1115_s23 }
  0x3f   :  { %p967_p13 = scmp.ne.s32.totalorder %s1115_s23, %s966_s20  ;;  %p972_p1 = scmp.lt.s32.totalorder %s966_s20, %s966_s20 }
  0x41   :  { %p973_p2 = por %p972_p1, %p971_p0 }
  0x43   :  { %p974_p3 = pnand %p973_p2, %p967_p13 }
  0x45   :  { %977 = shalt.err (!%p974_p3)
}
  0x46   :  { %74 = dma.hbm_to_vmem [thread:$0]  %s1239_s6, 512, %s1115_s23, [#allocation10], %s1010_s26, %s1010_s26, %s1011_s27  }
  0x47   :  { %1000 = dma.done.wait [#allocation4], 256  }
  0x48   :  { %1001 = vsyncadd [#allocation4], 4294967040 }
  0x49   :  { %1002 = dma.done.wait [#allocation7], 768  }
  0x4a   :  { %1003 = vsyncadd [#allocation7], 4294966528 }
  0x4b   :  { %1004 = dma.done.wait [#allocation10], 512  }
  0x4c   :  { %1005 = vsyncadd [#allocation10], 4294966784  ;;  %v191_v1 = vld [vmem:[#allocation8] sm:$0xff]  ;;  %v192_v2 = vld [vmem:[#allocation8 + $0x8] sm:$0xff]  ;;  %vm109_vm0 = vcmask 261120   ;;  %v1014_v17 = vmov 0.0  }
  0x4d   :  { %v193_v3 = vld [vmem:[#allocation8 + $0x10] sm:$0xff]  ;;  %v844_v4 = vpack.c.bf16 %v192_v2, %v191_v1  ;;  %v194_v5 = vld [vmem:[#allocation8 + $0x18] sm:$0xff]  ;;  %v99_v7 = vld [vmem:[%s1235_s2 + $0x8] sm:$0xff]  ;;  %vm1015_vm1 = vmmov 0   ;;  %vm381_vm2 = vcmask 64512   ;;  %vm428_vm3 = vcmask 1043456  }
  0x4e   :  { %v98_v6 = vld [vmem:[%s1235_s2] sm:$0xff]  ;;  %v848_v8 = vpack.c.bf16 %v194_v5, %v193_v3  ;;  %v96_v10 = vld [vmem:[#allocation6] sm:$0xff]  ;;  %v95_v16 = vld [vmem:[#allocation3 + $0x8] sm:$0xff]  ;;  %v1017_v58 = vmov 0.0|0.0   ;;  %vm535_vm4 = vcmask 1041409  }
  0x4f   :  { %v836_v9 = vpack.c.bf16 %v99_v7, %v98_v6  ;;  %v100_v11 = vld [vmem:[%s1235_s2 + $0x10] sm:$0xff]  ;;  %845 = vmatprep.subr.bf16.mxu1 %v844_v4  ;;  %787 = vmatprep.mubr.msk.f32.mxu1 %vm109_vm0, %v96_v10  ;;  %v101_v12 = vld [vmem:[%s1235_s2 + $0x18] sm:$0xff]  ;;  %v94_v13 = vld [vmem:[#allocation3] sm:$0xff] }
  0x50   :  { %847 = vmatpush3.bf16.msra.mxu1 %v844_v4  ;;  %v840_v14 = vpack.c.bf16 %v101_v12, %v100_v11  ;;  %776 = vmatprep.mubr.msk.f32.mxu0 %vm109_vm0, %v94_v13  ;;  %v97_v15 = vld [vmem:[#allocation6 + $0x8] sm:$0xff] }
  0x51   :  { %837 = vmatprep.subr.bf16.mxu0 %v836_v9  ;;  %849 = vmatprep.subr.bf16.mxu1 %v848_v8  ;;  %v726_v18 = vld [vmem:[%s1238_s5] ss:$0 sm:$0xff] }
  0x52   :  { %839 = vmatpush3.bf16.msra.mxu0 %v836_v9  ;;  %v723_v24 = vld [vmem:[%s1236_s3] ss:$0 sm:$0xff]  ;;  %s1016_s3 = smov 96  }
  0x53   :  { %841 = vmatprep.subr.bf16.mxu0 %v840_v14 }
  0x54   :  { %851 = vmatpush3.bf16.msra.mxu1 %v848_v8 }
  0x55   :  { %796 = vmatprep.subr.bf16.mxu1 %v1014_v17 }
  0x56   :  { %843 = vmatpush3.bf16.msra.mxu0 %v840_v14 }
  0x57   :  { %788 = vmatmul.mubr.msk.f32.vlgmr.msra.gmra.mrb[0].mxu1 %vm109_vm0, %v97_v15  ;;  %790 = vmatprep.subr.bf16.mxu0 %v1014_v17 }
  0x58   :  { %798 = vmatprep.mubr.msk.bf16.mxu1 %vm1015_vm1, %v1014_v17 }
  0x59   :  { %777 = vmatmul.mubr.msk.f32.vlgmr.msra.gmra.mrb[0].mxu0 %vm109_vm0, %v95_v16 }
  0x5a   :  { %792 = vmatprep.mubr.msk.bf16.mxu0 %vm1015_vm1, %v1014_v17 }
 0x12a   :  { %v789_v19 = vpop.f32.mrb[0].mxu1 }
 0x12b   :  { %v280_v20 = vadd.f32 %v789_v19, %v726_v18  ;;  %v274_v21 = vpop.f32.mrb[1].mxu1 }
 0x12c   :  { %v778_v22 = vpop.f32.mrb[0].mxu0  ;;  %v275_v23 = vadd.f32 %v726_v18, %v274_v21  ;;  %v522_v21 = vld [vmem:[#allocation9 + $0x8] sm:$0xff] }
 0x12d   :  { %v182_v25 = vpop.f32.mrb[1].mxu0  ;;  %v286_v26 = vpack.c.bf16 %v280_v20, %v280_v20  ;;  %v188_v29 = vadd.f32 %v778_v22, %v723_v24  ;;  %v521_v20 = vld [vmem:[#allocation9] sm:$0xff] }
 0x12e   :  { %v285_v27 = vpack.c.bf16 %v275_v23, %v275_v23  ;;  %v183_v31 = vadd.f32 %v723_v24, %v182_v25  ;;  %v853_v23 = vpack.c.bf16 %v522_v21, %v521_v20  ;;  %v523_v25 = vld [vmem:[#allocation9 + $0x10] sm:$0xff] }
 0x12f   :  { %v337_v28 = vsel %vm109_vm0, %v286_v26, 0  ;;  %v284_v32 = vpack.c.bf16 %v188_v29, %v188_v29  ;;  %v611_v29 = vld [vmem:[%s1241_s8 + $0x8] sm:$0xff] }
 0x130   :  { %v291_v30 = vsel %vm109_vm0, %v285_v27, 0  ;;  %797 = vmatpush3.bf16.xpose.msra.mxu1 %v337_v28  ;;  %v283_v33 = vpack.c.bf16 %v183_v31, %v183_v31  ;;  %v610_v28 = vld [vmem:[%s1241_s8] sm:$0xff] }
 0x131   :  { %791 = vmatpush3.bf16.xpose.msra.mxu0 %v291_v30  ;;  %808 = vmatprep.subr.bf16.mxu1 %v1014_v17  ;;  %v859_v30 = vpack.c.bf16 %v611_v29, %v610_v28 }
 0x132   :  { %802 = vmatprep.subr.bf16.mxu0 %v1014_v17 }
 0x137   :  { %799 = vmatmul.mubr.msk.bf16.vlgmr.msra.gmra.mrb[4].mxu1 %vm109_vm0, %v284_v32 }
 0x138   :  { %793 = vmatmul.mubr.msk.bf16.vlgmr.msra.gmra.mrb[4].mxu0 %vm109_vm0, %v283_v33  ;;  %810 = vmatprep.mubr.msk.bf16.mxu1 %vm1015_vm1, %v1014_v17 }
 0x139   :  { %804 = vmatprep.mubr.msk.bf16.mxu0 %vm1015_vm1, %v1014_v17 }
 0x20a   :  { %v373_v34 = vpop.f32.mrb[4].mxu1 }
 0x20b   :  { %v380_v35 = vmul.f32 0.17677669, %v373_v34  ;;  %v327_v36 = vpop.f32.mrb[4].mxu0  ;;  %v800_v37 = vpop.f32.mrb[5].mxu1 }
 0x20c   :  { %v794_v38 = vpop.f32.mrb[5].mxu0  ;;  %v376_v39 = vpop.f32.mrb[6].mxu1  ;;  %v379_v40 = vmul.f32 0.17677669, %v327_v36 }
 0x20d   :  { %v330_v41 = vpop.f32.mrb[6].mxu0  ;;  %v801_v42 = vpop.f32.mrb[7].mxu1  ;;  %v385_v43 = vsel %vm381_vm2, %v380_v35, -inf }
 0x20e   :  { %386 = vmax.xlane.f32.xlu0 %v385_v43  ;;  %v795_v44 = vpop.f32.mrb[7].mxu0  ;;  %v382_v45 = vsel %vm381_vm2, %v379_v40, -inf  ;;  %v613_v41 = vld [vmem:[%s1241_s8 + $0x18] sm:$0xff]  ;;  %v733_v43 = vld [vmem:[%s1240_s7] ss:$0 sm:$0xff]  ;;  %s1019_s7 = smov [#allocation11]  }
 0x212   :  { %383 = vmax.xlane.f32.xlu0 %v382_v45 }
 0x228   :  { %473 = vrot.lane.b32.xlu0 %v286_v26, %s1016_s3  ;;  %v524_v26 = vld [vmem:[#allocation9 + $0x18] sm:$0xff] }
 0x29b   :  { %v387_v46 = vpop.xlane.xlu0 %386 }
 0x29c   :  { %v389_v47 = vsub.f32 %v380_v35, %v387_v46 }
 0x29e   :  { %v392_v48 = vmul.f32 1.442695, %v389_v47 }
 0x29f   :  { %v384_v49 = vpop.xlane.xlu0 %383 }
 0x2a0   :  { %878 = vpow2.f32 %v392_v48  ;;  %v388_v50 = vsub.f32 %v379_v40, %v384_v49  ;;  %v612_v40 = vld [vmem:[%s1241_s8 + $0x10] sm:$0xff]  ;;  %v1018_v48 = vmov 0   ;;  %v735_v49 = vld [vmem:[#allocation2] ss:$0 sm:$0xff]  ;;  %s712_s8 = sshll.u32 %s1019_s7, 4  ;;  %s713_s8 = int_to_ptr.vmem [resolvable:$true] %s712_s8 }
 0x2a1   :  { %v862_v42 = vpack.c.bf16 %v613_v41, %v612_v40  ;;  %876 = vset.pattern.permute.xlu1 %v1018_v48  ;;  %877 = vset.pattern.permute.xlu0 %v1018_v48  ;;  %s978_s1 = scalar_lea.vmem %s713_s8, 32  ;;  %p983_p5 = scmp.lt.s32.totalorder %s713_s8, %s713_s8 }
 0x2a2   :  { %v390_v51 = vmul.f32 1.442695, %v388_v50  ;;  %p979_p4 = scmp.ne.s32.totalorder %s713_s8, %s978_s1  ;;  %p984_p6 = scmp.lt.s32.totalorder %s978_s1, %s978_s1 }
 0x2a3   :  { %v474_v52 = vpop.permute.xlu0 %473 }
 0x2a4   :  { %880 = vpow2.f32 %v390_v51  ;;  %v479_v53 = vsel %vm428_vm3, %v474_v52, 0  ;;  %p985_p7 = por %p984_p6, %p983_p5 }
 0x2a5   :  { %809 = vmatpush3.bf16.msra.mxu1 %v479_v53 }
 0x2a6   :  { %858 = vmatprep.subr.bf16.mxu1 %v1017_v58  ;;  %p986_p8 = pnand %p985_p7, %p979_p4 }
 0x2aa   :  { %v879_v54 = vpop.eup %878 }
 0x2ab   :  { %v397_v55 = vsel %vm381_vm2, %v879_v54, 0.0 }
 0x2ac   :  { %398 = vadd.xlane.f32.xlu1 %v397_v55 }
 0x2ae   :  { %v881_v56 = vpop.eup %880 }
 0x2af   :  { %v394_v57 = vsel %vm381_vm2, %v881_v56, 0.0 }
 0x2b0   :  { %395 = vadd.xlane.f32.xlu1 %v394_v57 }
 0x2c1   :  { %423 = vrot.lane.b32.xlu1 %v285_v27, %s1016_s3  ;;  %v856_v27 = vpack.c.bf16 %v524_v26, %v523_v25 }
 0x339   :  { %v399_v59 = vpop.xlane.xlu1 %398 }
 0x33a   :  { %882 = vrcp.f32 %v399_v59 }
 0x33d   :  { %v396_v60 = vpop.xlane.xlu1 %395 }
 0x33e   :  { %884 = vrcp.f32 %v396_v60 }
 0x341   :  { %v424_v61 = vpop.permute.xlu1 %423 }
 0x342   :  { %v430_v62 = vsel %vm428_vm3, %v424_v61, 0 }
 0x343   :  { %803 = vmatpush3.bf16.msra.mxu0 %v430_v62 }
 0x344   :  { %v883_v63 = vpop.eup %882  ;;  %852 = vmatprep.subr.bf16.mxu0 %v1017_v58 }
 0x345   :  { %v403_v0 = vmul.f32 %v883_v63, %v879_v54 }
 0x347   :  { %v411_v1 = vsel %vm381_vm2, %v403_v0, 0.0 }
 0x348   :  { %v885_v2 = vpop.eup %884  ;;  %v412_v3 = vrot.slane %v411_v1, 4 }
 0x349   :  { %v402_v4 = vmul.f32 %v885_v2, %v881_v56 }
 0x34a   :  { %v413_v5 = vadd.f32 %v412_v3, %v411_v1 }
 0x34b   :  { %v404_v6 = vsel %vm381_vm2, %v402_v4, 0.0 }
 0x34c   :  { %v414_v7 = vrot.slane %v413_v5, 2  ;;  %v405_v8 = vrot.slane %v404_v6, 4 }
 0x34e   :  { %v406_v9 = vadd.f32 %v405_v8, %v404_v6  ;;  %v415_v10 = vadd.f32 %v414_v7, %v413_v5 }
 0x350   :  { %v407_v11 = vrot.slane %v406_v9, 2  ;;  %v416_v12 = vrot.slane %v415_v10, 1 }
 0x352   :  { %v417_v13 = vadd.f32 %v416_v12, %v415_v10  ;;  %v408_v14 = vadd.f32 %v407_v11, %v406_v9 }
 0x354   :  { %v419_v15 = vmul.f32 0.125, %v417_v13  ;;  %v409_v16 = vrot.slane %v408_v14, 1 }
 0x356   :  { %v421_v18 = vpack.c.bf16 %v419_v15, %v419_v15  ;;  %v410_v19 = vadd.f32 %v409_v16, %v408_v14 }
 0x358   :  { %811 = vmatmul.mubr.msk.bf16.vlgmr.msra.gmra.mrb[8].mxu1 %vm381_vm2, %v421_v18  ;;  %v418_v22 = vmul.f32 0.125, %v410_v19 }
 0x359   :  { %833 = vmatprep.mubr.msk.f32.mxu1 %vm1015_vm1, %v1014_v17  ;;  %860 = vmatpush3.bf16.msra.mxu1 %v859_v30 }
 0x35a   :  { %v420_v24 = vpack.c.bf16 %v418_v22, %v418_v22  ;;  %861 = vmatprep.subr.bf16.mxu1 %v1017_v58 }
 0x35c   :  { %805 = vmatmul.mubr.msk.bf16.vlgmr.msra.gmra.mrb[8].mxu0 %vm381_vm2, %v420_v24 }
 0x35d   :  { %854 = vmatpush3.bf16.msra.mxu0 %v853_v23  ;;  %822 = vmatprep.mubr.msk.f32.mxu0 %vm1015_vm1, %v1014_v17 }
 0x35e   :  { %855 = vmatprep.subr.bf16.mxu0 %v1017_v58  ;;  %863 = vmatpush3.bf16.msra.mxu1 %v862_v42 }
 0x361   :  { %857 = vmatpush3.bf16.msra.mxu0 %v856_v27 }
 0x42b   :  { %v515_v31 = vpop.f32.mrb[8].mxu1 }
 0x42c   :  { %v812_v32 = vpop.f32.mrb[9].mxu1  ;;  %v534_v17 = vrot.slane %v515_v31, 7 }
 0x42d   :  { %v518_v33 = vpop.f32.mrb[10].mxu1 }
 0x42e   :  { %v813_v34 = vpop.f32.mrb[11].mxu1 }
 0x42f   :  { %v466_v35 = vpop.f32.mrb[8].mxu0 }
 0x430   :  { %v536_v36 = vsel %vm535_vm4, %v534_v17, %v466_v35  ;;  %v806_v37 = vpop.f32.mrb[9].mxu0 }
 0x431   :  { %v469_v38 = vpop.f32.mrb[10].mxu0  ;;  %823 = vmatmul.mubr.msk.f32.vlgmr.msra.gmra.mrb[2].mxu0 %vm109_vm0, %v536_v36 }
 0x432   :  { %v807_v39 = vpop.f32.mrb[11].mxu0 }
 0x504   :  { %v605_v44 = vpop.f32.mrb[2].mxu0 }
 0x505   :  { %v606_v45 = vadd.f32 %v733_v43, %v605_v44  ;;  %v824_v46 = vpop.f32.mrb[3].mxu0 }
 0x507   :  { %v609_v47 = vmax.f32 %v606_v45, 0.0 }
 0x509   :  { %834 = vmatmul.mubr.msk.f32.vlgmr.msra.gmra.mrb[2].mxu1 %vm109_vm0, %v609_v47 }
 0x5dc   :  { %v690_v50 = vpop.f32.mrb[2].mxu1 }
 0x5dd   :  { %v691_v51 = vadd.f32 %v735_v49, %v690_v50  ;;  %v835_v52 = vpop.f32.mrb[3].mxu1 }
 0x5df   :  { %v737_v53 = vmul.f32 -1.442695, %v691_v51 }
 0x5e1   :  { %886 = vpow2.f32 %v737_v53 }
 0x5eb   :  { %v887_v54 = vpop.eup %886 }
 0x5ec   :  { %v697_v55 = vadd.f32 1.0, %v887_v54 }
 0x5ee   :  { %888 = vrcp.f32 %v697_v55 }
 0x5f8   :  { %v889_v56 = vpop.eup %888 }
 0x5f9   :  { %702 = vperm.xlu1 %876, %v889_v56  }
 0x678   :  { %v703_v57 = vpop.permute.xlu1 %702 }
 0x679   :  { %705 = vst [vmem:[#allocation11] sm:$0x3] %v703_v57 }
 0x67a   :  { %989 = shalt.err (!%p986_p8)
}
 0x67b   :  { %s990_s4 = scalar_lea.hbm %s1243_s10, 32 }
 0x67c   :  { %p991_p9 = scmp.ne.s32.totalorder %s1243_s10, %s990_s4  ;;  %p994_p10 = scmp.lt.u32.totalorder %s990_s4, %s1243_s10 }
 0x67e   :  { %p996_p11 = pnand %p994_p10, %p991_p9 }
 0x680   :  { %999 = shalt.err (!%p996_p11)
}
 0x681   :  { %715 = dma.vmem_to_hbm [thread:$0]  %s713_s8, 32, %s1243_s10, [#allocation5]  }
 0x682   :  { %1006 = dma.done.wait [#allocation5], 32  }
 0x683   :  { %1007 = vsyncadd [#allocation5], 4294967264 }
 0x684   :  { %719 = vsyncpa [#allocation4], 1 }
 0x685   :  { %720 = vsyncpa [#allocation7], 1 }
 0x686   :  { %721 = vsyncpa [#allocation10], 1 }
 0x687   :  { %722 = vsyncpa [#allocation5], 1 }

</bundles_post_ra>
